<compile_context>
chip_gen: v5e
topology: v5e:2x2
jax: 0.10.0
libtpu: 0.0.40
codegen_flags: <defaults>
</compile_context>

<pallas_src>
import jax
import jax.numpy as jnp
from jax.experimental import pallas as pl
from jax.experimental.pallas import tpu as pltpu

# ----------------------------- hyper-params (small) ------------------------------
BATCH = 4            # per-view batch (N)
IMG_C, IMG_H, IMG_W = 3, 8, 8
STEM_C = 32          # conv1 output channels (dim_mlp analogue)
FEAT_DIM = 16        # MoCo feature dim ("dim")
QUEUE_K = 64         # queue size K (must be divisible by 2*BATCH)
MOMENTUM = 0.999     # m
TEMP = 0.07          # T

PAD = 128                         # lane-aligned feature width
HW = IMG_H * IMG_W                # spatial positions per image
NB = 2 * BATCH                    # images per encoder pass (both views stacked)
M_ROWS = NB * HW                  # im2col rows per encoder pass
PATCH_F = IMG_C * 9               # 27 im2col features

assert QUEUE_K % NB == 0

_VMEM = pl.BlockSpec(memory_space=pltpu.MemorySpace.VMEM)
_SMEM = pl.BlockSpec(memory_space=pltpu.MemorySpace.SMEM)
_ANY = pl.BlockSpec(memory_space=pl.ANY)


# ----------------------------- fused encoder kernel -------------------------------
def _encoder_kernel(patches_ref, avg_ref, conv_w_ref, cell_w_ref, cell_b_ref,
                    fc_w_ref, fc_b_ref, out_ref):
    """One grid step == one encoder (0: query encoder, 1: key encoder)."""
    p = patches_ref[0]                                                        # (M, 128)
    # conv1 (3x3, no bias) lowered to a single matmul on lane-padded im2col patches
    h = jnp.dot(p, conv_w_ref[0], preferred_element_type=jnp.float32)
    h = jnp.maximum(h, 0.0)                                                   # ReLU
    # global average pool as an MXU matmul with a constant averaging matrix
    pooled = jnp.dot(avg_ref[...], h, preferred_element_type=jnp.float32)     # (NB, 128)
    # Cell (single Linear gene) and final fc, all zero-padded to 128 lanes
    c = jnp.dot(pooled, cell_w_ref[0], preferred_element_type=jnp.float32) + cell_b_ref[0]
    f = jnp.dot(c, fc_w_ref[0], preferred_element_type=jnp.float32) + fc_b_ref[0]
    # L2 normalize (padded cols are exactly 0, so the full-row sum equals the valid sum)
    ssq = jnp.sum(f * f, axis=1, keepdims=True)
    out_ref[0] = f * jax.lax.rsqrt(jnp.maximum(ssq, 1e-24))


def _encoder_pallas(patches_s, avg_mat, conv_w_s, cell_w_s, cell_b_s, fc_w_s, fc_b_s):
    return pl.pallas_call(
        _encoder_kernel,
        out_shape=jax.ShapeDtypeStruct((2, NB, PAD), jnp.float32),
        grid=(2,),
        in_specs=[
            pl.BlockSpec((1, M_ROWS, PAD), lambda e: (e, 0, 0)),   # patches per encoder
            pl.BlockSpec((NB, M_ROWS), lambda e: (0, 0)),          # shared GAP matrix
            pl.BlockSpec((1, PAD, PAD), lambda e: (e, 0, 0)),      # conv weight
            pl.BlockSpec((1, PAD, PAD), lambda e: (e, 0, 0)),      # cell weight
            pl.BlockSpec((1, 1, PAD), lambda e: (e, 0, 0)),        # cell bias
            pl.BlockSpec((1, PAD, PAD), lambda e: (e, 0, 0)),      # fc weight
            pl.BlockSpec((1, 1, PAD), lambda e: (e, 0, 0)),        # fc bias
        ],
        out_specs=pl.BlockSpec((1, NB, PAD), lambda e: (e, 0, 0)),
        compiler_params=pltpu.CompilerParams(dimension_semantics=("parallel",)),
    )(patches_s, avg_mat, conv_w_s, cell_w_s, cell_b_s, fc_w_s, fc_b_s)


# -------------------- fused contrastive loss + queue enqueue ----------------------
def _loss_enqueue_kernel(ptr_ref, q_ref, k_ref, queue_in_ref,
                         loss_ref, queue_out_ref, qbuf, sems):
    # Stage the (old) queue HBM -> VMEM for the negatives matmul.
    load = pltpu.make_async_copy(queue_in_ref, qbuf, sems.at[0])
    load.start()
    load.wait()

    qv = q_ref[...]                                                     # (2N, 128)
    kv = k_ref[...]                                                     # (2N, 128)
    inv_t = 1.0 / TEMP
    l_pos = jnp.sum(qv * kv, axis=1, keepdims=True) * inv_t             # (2N, 1)
    # l_neg = q @ queue^T  (queue stored (K, 128) lane-padded, contraction over features)
    l_neg = jax.lax.dot_general(
        qv, qbuf[...], (((1,), (1,)), ((), ())),
        preferred_element_type=jnp.float32) * inv_t                     # (2N, K)
    # cross-entropy with label 0: loss_i = logsumexp([l_pos_i, l_neg_i]) - l_pos_i
    mx = jnp.maximum(jnp.max(l_neg, axis=1, keepdims=True), l_pos)
    se = jnp.exp(l_pos - mx) + jnp.sum(jnp.exp(l_neg - mx), axis=1, keepdims=True)
    per = jnp.log(se) + mx - l_pos                                      # (2N, 1)
    # loss_12 + loss_21 == sum of all 2N per-sample losses / N
    loss_ref[0, 0] = jnp.sum(per) * (1.0 / BATCH)

    # In-place enqueue of keys = cat([k1, k2]); k_ref rows are [k2 ; k1].
    # queue_out_ref is HBM-resident and aliased to queue_in_ref (loss already used
    # the old values staged in qbuf, so the overwrite below is safe).
    ptr = ptr_ref[0]
    cp1 = pltpu.make_async_copy(k_ref.at[pl.ds(BATCH, BATCH)],            # k1
                                queue_out_ref.at[pl.ds(ptr, BATCH)], sems.at[0])
    cp2 = pltpu.make_async_copy(k_ref.at[pl.ds(0, BATCH)],                # k2
                                queue_out_ref.at[pl.ds(ptr + BATCH, BATCH)], sems.at[1])
    cp1.start()
    cp2.start()
    cp1.wait()
    cp2.wait()


def _loss_and_enqueue(queue_ptr, q_all, k_all, queue_padded):
    loss, new_queue = pl.pallas_call(
        _loss_enqueue_kernel,
        out_shape=(jax.ShapeDtypeStruct((1, 1), jnp.float32),
                   jax.ShapeDtypeStruct((QUEUE_K, PAD), jnp.float32)),
        in_specs=[_SMEM, _VMEM, _VMEM, _ANY],
        out_specs=(_SMEM, _ANY),
        scratch_shapes=[pltpu.VMEM((QUEUE_K, PAD), jnp.float32),
                        pltpu.SemaphoreType.DMA((2,))],
        input_output_aliases={3: 1},
    )(queue_ptr, q_all, k_all, queue_padded)
    return loss[0, 0], new_queue


# ----------------------------- momentum update (single kernel) --------------------
def _momentum_kernel(q_ref, k_ref, o_ref):
    o_ref[...] = k_ref[...] * MOMENTUM + q_ref[...] * (1.0 - MOMENTUM)


def _momentum_update(params_q, params_k):
    leaves_q, treedef = jax.tree_util.tree_flatten(params_q)
    leaves_k = jax.tree_util.tree_flatten(params_k)[0]
    shapes = [l.shape for l in leaves_q]
    sizes = [l.size for l in leaves_q]
    total = sum(sizes)
    padded = pl.cdiv(total, 8 * 128) * 8 * 128        # full (8,128) tile alignment

    def flat(leaves):
        v = jnp.concatenate([l.reshape(-1) for l in leaves])
        return jnp.pad(v, (0, padded - total)).reshape(padded // 128, 128)

    out = pl.pallas_call(
        _momentum_kernel,
        out_shape=jax.ShapeDtypeStruct((padded // 128, 128), jnp.float32),
        in_specs=[_VMEM, _VMEM],
        out_specs=_VMEM,
    )(flat(leaves_q), flat(leaves_k)).reshape(-1)

    new_leaves, off = [], 0
    for s, shp in zip(sizes, shapes):
        new_leaves.append(out[off:off + s].reshape(shp))
        off += s
    return jax.tree_util.tree_unflatten(treedef, new_leaves)


# ----------------------------- XLA glue (im2col, padding, packing) -----------------
def _im2col_3x3_same(x_nchw):
    """3x3 / stride 1 / pad 1 patches; feature order (Cin, kh, kw) matches conv weight."""
    n, c, h, w = x_nchw.shape
    xp = jnp.pad(x_nchw, ((0, 0), (0, 0), (1, 1), (1, 1)))
    cols = []
    for dh in range(3):
        for dw in range(3):
            cols.append(xp[:, :, dh:dh + h, dw:dw + w])       # (N, C, H, W)
    patches = jnp.stack(cols, axis=2)                         # (N, C, 9, H, W)
    patches = patches.transpose(0, 3, 4, 1, 2)                # (N, H, W, C, 9)
    return patches.reshape(n * h * w, c * 9)


def _pad2(x, rows, cols):
    return jnp.pad(x, ((0, rows - x.shape[0]), (0, cols - x.shape[1])))


def _packed_encoder_params(p):
    conv = _pad2(p["conv_w"].reshape(STEM_C, PATCH_F).T, PAD, PAD)   # (27,32) -> (128,128)
    cw = _pad2(p["cell_w"], PAD, PAD)
    cb = _pad2(p["cell_b"].reshape(1, -1), 1, PAD)
    fw = _pad2(p["fc_w"], PAD, PAD)
    fb = _pad2(p["fc_b"].reshape(1, -1), 1, PAD)
    return conv, cw, cb, fw, fb


# ----------------------------- MoCo forward ----------------------------------------
def moco_forward(params_q, params_k, queue, queue_ptr, im_q, im_k, rng):
    """queue is stored lane-padded: (QUEUE_K, PAD) with zeros beyond FEAT_DIM."""
    # momentum update of the key encoder: one fused elementwise kernel over all params
    params_k = _momentum_update(params_q, params_k)

    n = im_q.shape[0]
    key1, key2 = jax.random.split(rng)
    shuf1 = jax.random.permutation(key1, n)        # shuffle for enc_k(im_k)  (dir 1->2)
    shuf2 = jax.random.permutation(key2, n)        # shuffle for enc_k(im_q)  (dir 2->1)
    unshuf1 = jnp.argsort(shuf1)
    unshuf2 = jnp.argsort(shuf2)

    # stack both views per encoder: one fused encoder call handles q- and k-encoders
    x_q = jnp.concatenate([im_q, im_k], axis=0)                      # query-encoder input
    x_k = jnp.concatenate([im_k[shuf1], im_q[shuf2]], axis=0)        # key-encoder input (BN shuffle trick)
    patches = jnp.stack([_im2col_3x3_same(x_q), _im2col_3x3_same(x_k)], axis=0)
    patches = jnp.pad(patches, ((0, 0), (0, 0), (0, PAD - PATCH_F)))  # (2, M_ROWS, 128)

    packed = [jnp.stack([a, b], axis=0) for a, b in
              zip(_packed_encoder_params(params_q), _packed_encoder_params(params_k))]
    avg_mat = jnp.repeat(jnp.eye(NB, dtype=jnp.float32), HW, axis=1) / HW   # (NB, M_ROWS)

    feats = _encoder_pallas(patches, avg_mat, *packed)               # (2, 2N, 128), L2-normalized
    q_all = feats[0]                                                 # [q1 ; q2]
    k_shuf = jax.lax.stop_gradient(feats[1])                         # key encoder has no grads
    k2 = k_shuf[:n][unshuf1]                                         # unshuffle
    k1 = k_shuf[n:][unshuf2]
    k_all = jnp.concatenate([k2, k1], axis=0)                        # row-aligned with [q1 ; q2]

    # fused: contrastive loss (loss_12 + loss_21) + in-place enqueue of cat([k1, k2])
    loss, queue = _loss_and_enqueue(queue_ptr, q_all, k_all, queue)
    queue_ptr = (queue_ptr + NB) % QUEUE_K
    return loss, params_k, queue, queue_ptr


# ----------------------------- parameter init --------------------------------------
def init_params(key):
    k1, k2, k3, k4, k5 = jax.random.split(key, 5)
    return {
        # conv1 weight in PyTorch layout (Cout, Cin, kh, kw), no bias
        "conv_w": 0.1 * jax.random.normal(k1, (STEM_C, IMG_C, 3, 3), jnp.float32),
        # Cell gene op = Linear(dim_mlp -> dim_mlp); stored as (in, out) for x @ W
        "cell_w": 0.1 * jax.random.normal(k2, (STEM_C, STEM_C), jnp.float32),
        "cell_b": 0.01 * jax.random.normal(k3, (STEM_C,), jnp.float32),
        # fc: Linear(dim_mlp -> feature dim)
        "fc_w": 0.1 * jax.random.normal(k4, (STEM_C, FEAT_DIM), jnp.float32),
        "fc_b": 0.01 * jax.random.normal(k5, (FEAT_DIM,), jnp.float32),
    }


if __name__ == "__main__":
    root = jax.random.PRNGKey(0)
    k_param, k_queue, k_imq, k_imk, k_shuffle = jax.random.split(root, 5)

    params_q = init_params(k_param)
    # key encoder initialized as a copy of the query encoder (as in MoCo.__init__)
    params_k = jax.tree_util.tree_map(lambda a: a.copy(), params_q)

    # queue: equivalent to torch's randn(dim, K) normalized along dim=0;
    # stored (K, dim) and lane-padded to (K, 128) with exact zeros beyond dim.
    queue = jax.random.normal(k_queue, (QUEUE_K, FEAT_DIM), jnp.float32)
    queue = queue / jnp.maximum(jnp.linalg.norm(queue, axis=1, keepdims=True), 1e-12)
    queue = jnp.pad(queue, ((0, 0), (0, PAD - FEAT_DIM)))
    queue_ptr = jnp.zeros((1,), jnp.int32)

    im_q = jax.random.normal(k_imq, (BATCH, IMG_C, IMG_H, IMG_W), jnp.float32)
    im_k = jax.random.normal(k_imk, (BATCH, IMG_C, IMG_H, IMG_W), jnp.float32)

    step = jax.jit(moco_forward)
    # two steps: exercises the aliased in-place enqueue and the pointer advance
    loss, params_k, queue, queue_ptr = step(
        params_q, params_k, queue, queue_ptr, im_q, im_k, k_shuffle)
    loss, params_k, queue, queue_ptr = step(
        params_q, params_k, queue, queue_ptr, im_q, im_k, k_shuffle)
    loss = jax.block_until_ready(loss)
    jax.block_until_ready(queue)

    assert jnp.isfinite(loss)
    print("KERNEL_OK")
</pallas_src>

<mosaic_0001>
module attributes {stable_mosaic.version = 11 : i64} {
  func.func @_momentum_kernel(%arg0: memref<24x128xf32, #tpu.memory_space<vmem>>, %arg1: memref<24x128xf32, #tpu.memory_space<vmem>>, %arg2: memref<24x128xf32, #tpu.memory_space<vmem>>) attributes {dimension_semantics = [], scalar_prefetch = 0 : i64, scratch_operands = 0 : i64, tpu.core_type = #tpu.core_type<tc>} {
    %c0 = arith.constant 0 : index
    %c0_0 = arith.constant 0 : index
    %0 = vector.load %arg1[%c0, %c0_0] : memref<24x128xf32, #tpu.memory_space<vmem>>, vector<24x128xf32>
    %cst = arith.constant 9.990000e-01 : f32
    %1 = vector.broadcast %cst : f32 to vector<24x128xf32>
    %2 = arith.mulf %0, %1 : vector<24x128xf32>
    %c0_1 = arith.constant 0 : index
    %c0_2 = arith.constant 0 : index
    %3 = vector.load %arg0[%c0_1, %c0_2] : memref<24x128xf32, #tpu.memory_space<vmem>>, vector<24x128xf32>
    %cst_3 = arith.constant 1.000000e-03 : f32
    %4 = vector.broadcast %cst_3 : f32 to vector<24x128xf32>
    %5 = arith.mulf %3, %4 : vector<24x128xf32>
    %6 = arith.addf %2, %5 : vector<24x128xf32>
    %c0_4 = arith.constant 0 : index
    %c0_5 = arith.constant 0 : index
    %7 = vector.load %arg2[%c0_4, %c0_5] : memref<24x128xf32, #tpu.memory_space<vmem>>, vector<24x128xf32>
    tpu.vector_store %arg2[%c0_4, %c0_5], %6 {strides = array<i32>} : memref<24x128xf32, #tpu.memory_space<vmem>>, vector<24x128xf32>,
    return
  }
}

module attributes {stable_mosaic.version = 11 : i64} {
  func.func @_encoder_kernel(%arg0: i32, %arg1: memref<1x512x128xf32, #tpu.memory_space<vmem>>, %arg2: memref<8x512xf32, #tpu.memory_space<vmem>>, %arg3: memref<1x128x128xf32, #tpu.memory_space<vmem>>, %arg4: memref<1x128x128xf32, #tpu.memory_space<vmem>>, %arg5: memref<1x1x128xf32, #tpu.memory_space<vmem>>, %arg6: memref<1x128x128xf32, #tpu.memory_space<vmem>>, %arg7: memref<1x1x128xf32, #tpu.memory_space<vmem>>, %arg8: memref<1x8x128xf32, #tpu.memory_space<vmem>>) attributes {dimension_semantics = [#tpu.dimension_semantics<parallel>], iteration_bounds = array<i64: 2>, scalar_prefetch = 0 : i64, scratch_operands = 0 : i64, tpu.core_type = #tpu.core_type<tc>, window_params = [{transform_indices = @transform_0, window_bounds = array<i64: 1, 512, 128>}, {pipeline_mode = #tpu.pipeline_mode<synchronous>, transform_indices = @transform_1, window_bounds = array<i64: 8, 512>}, {transform_indices = @transform_2, window_bounds = array<i64: 1, 128, 128>}, {transform_indices = @transform_3, window_bounds = array<i64: 1, 128, 128>}, {transform_indices = @transform_4, window_bounds = array<i64: 1, 1, 128>}, {transform_indices = @transform_5, window_bounds = array<i64: 1, 128, 128>}, {transform_indices = @transform_6, window_bounds = array<i64: 1, 1, 128>}, {transform_indices = @transform_7, window_bounds = array<i64: 1, 8, 128>}]} {
    %c0 = arith.constant 0 : index
    %c0_0 = arith.constant 0 : index
    %c0_1 = arith.constant 0 : index
    %0 = vector.load %arg1[%c0, %c0_0, %c0_1] : memref<1x512x128xf32, #tpu.memory_space<vmem>>, vector<1x512x128xf32>
    %1 = vector.shape_cast %0 : vector<1x512x128xf32> to vector<512x128xf32>
    %c0_2 = arith.constant 0 : index
    %c0_3 = arith.constant 0 : index
    %c0_4 = arith.constant 0 : index
    %2 = vector.load %arg3[%c0_2, %c0_3, %c0_4] : memref<1x128x128xf32, #tpu.memory_space<vmem>>, vector<1x128x128xf32>
    %3 = vector.shape_cast %2 : vector<1x128x128xf32> to vector<128x128xf32>
    %cst = arith.constant dense<0.000000e+00> : vector<512x128xf32>
    %4 = tpu.matmul %1, %3, %cst {dimension_numbers = #tpu.dot_dimension_numbers<[1], [0], [0], [1], [0, 0, 1, 1], [], []>} : vector<512x128xf32>, vector<128x128xf32>, vector<512x128xf32> -> vector<512x128xf32>
    %cst_5 = arith.constant 0.000000e+00 : f32
    %5 = vector.broadcast %cst_5 : f32 to vector<512x128xf32>
    %6 = arith.maximumf %4, %5 : vector<512x128xf32>
    %c0_6 = arith.constant 0 : index
    %c0_7 = arith.constant 0 : index
    %7 = vector.load %arg2[%c0_6, %c0_7] : memref<8x512xf32, #tpu.memory_space<vmem>>, vector<8x512xf32>
    %cst_8 = arith.constant dense<0.000000e+00> : vector<8x128xf32>
    %8 = tpu.matmul %7, %6, %cst_8 {dimension_numbers = #tpu.dot_dimension_numbers<[1], [0], [0], [1], [0, 0, 1, 1], [], []>} : vector<8x512xf32>, vector<512x128xf32>, vector<8x128xf32> -> vector<8x128xf32>
    %c0_9 = arith.constant 0 : index
    %c0_10 = arith.constant 0 : index
    %c0_11 = arith.constant 0 : index
    %9 = vector.load %arg4[%c0_9, %c0_10, %c0_11] : memref<1x128x128xf32, #tpu.memory_space<vmem>>, vector<1x128x128xf32>
    %10 = vector.shape_cast %9 : vector<1x128x128xf32> to vector<128x128xf32>
    %cst_12 = arith.constant dense<0.000000e+00> : vector<8x128xf32>
    %11 = tpu.matmul %8, %10, %cst_12 {dimension_numbers = #tpu.dot_dimension_numbers<[1], [0], [0], [1], [0, 0, 1, 1], [], []>} : vector<8x128xf32>, vector<128x128xf32>, vector<8x128xf32> -> vector<8x128xf32>
    %c0_13 = arith.constant 0 : index
    %c0_14 = arith.constant 0 : index
    %c0_15 = arith.constant 0 : index
    %12 = vector.load %arg5[%c0_13, %c0_14, %c0_15] : memref<1x1x128xf32, #tpu.memory_space<vmem>>, vector<1x1x128xf32>
    %13 = vector.shape_cast %12 : vector<1x1x128xf32> to vector<1x128xf32>
    %14 = vector.broadcast %13 : vector<1x128xf32> to vector<8x128xf32>
    %15 = arith.addf %11, %14 : vector<8x128xf32>
    %c0_16 = arith.constant 0 : index
    %c0_17 = arith.constant 0 : index
    %c0_18 = arith.constant 0 : index
    %16 = vector.load %arg6[%c0_16, %c0_17, %c0_18] : memref<1x128x128xf32, #tpu.memory_space<vmem>>, vector<1x128x128xf32>
    %17 = vector.shape_cast %16 : vector<1x128x128xf32> to vector<128x128xf32>
    %cst_19 = arith.constant dense<0.000000e+00> : vector<8x128xf32>
    %18 = tpu.matmul %15, %17, %cst_19 {dimension_numbers = #tpu.dot_dimension_numbers<[1], [0], [0], [1], [0, 0, 1, 1], [], []>} : vector<8x128xf32>, vector<128x128xf32>, vector<8x128xf32> -> vector<8x128xf32>
    %c0_20 = arith.constant 0 : index
    %c0_21 = arith.constant 0 : index
    %c0_22 = arith.constant 0 : index
    %19 = vector.load %arg7[%c0_20, %c0_21, %c0_22] : memref<1x1x128xf32, #tpu.memory_space<vmem>>, vector<1x1x128xf32>
    %20 = vector.shape_cast %19 : vector<1x1x128xf32> to vector<1x128xf32>
    %21 = vector.broadcast %20 : vector<1x128xf32> to vector<8x128xf32>
    %22 = arith.addf %18, %21 : vector<8x128xf32>
    %23 = arith.mulf %22, %22 : vector<8x128xf32>
    %cst_23 = arith.constant dense<0.000000e+00> : vector<8xf32>
    %24 = vector.multi_reduction <add>, %23, %cst_23 [1] : vector<8x128xf32> to vector<8xf32>
    %25 = vector.shape_cast %24 : vector<8xf32> to vector<8x1xf32>
    %cst_24 = arith.constant 1.000000e-24 : f32
    %26 = vector.broadcast %cst_24 : f32 to vector<8x1xf32>
    %27 = arith.maximumf %25, %26 : vector<8x1xf32>
    %28 = math.rsqrt %27 : vector<8x1xf32>
    %29 = vector.broadcast %28 : vector<8x1xf32> to vector<8x128xf32>
    %30 = arith.mulf %22, %29 : vector<8x128xf32>
    %c0_25 = arith.constant 0 : index
    %c0_26 = arith.constant 0 : index
    %c0_27 = arith.constant 0 : index
    %31 = vector.load %arg8[%c0_25, %c0_26, %c0_27] : memref<1x8x128xf32, #tpu.memory_space<vmem>>, vector<1x8x128xf32>
    %32 = vector.shape_cast %31 : vector<1x8x128xf32> to vector<8x128xf32>
    %33 = vector.shape_cast %30 : vector<8x128xf32> to vector<1x8x128xf32>
    tpu.vector_store %arg8[%c0_25, %c0_26, %c0_27], %33 {strides = array<i32>} : memref<1x8x128xf32, #tpu.memory_space<vmem>>, vector<1x8x128xf32>,
    return
  }
  func.func @transform_0(%arg0: i32) -> (i32, i32, i32) {
    %c0_i32 = arith.constant 0 : i32
    %c0_i32_0 = arith.constant 0 : i32
    %c0_i32_1 = arith.constant 0 : i32
    return %arg0, %c0_i32, %c0_i32_0 : i32, i32, i32
  }
  func.func @transform_1(%arg0: i32) -> (i32, i32) {
    %c0_i32 = arith.constant 0 : i32
    %c0_i32_0 = arith.constant 0 : i32
    %c0_i32_1 = arith.constant 0 : i32
    return %c0_i32, %c0_i32_0 : i32, i32
  }
  func.func @transform_2(%arg0: i32) -> (i32, i32, i32) {
    %c0_i32 = arith.constant 0 : i32
    %c0_i32_0 = arith.constant 0 : i32
    %c0_i32_1 = arith.constant 0 : i32
    return %arg0, %c0_i32, %c0_i32_0 : i32, i32, i32
  }
  func.func @transform_3(%arg0: i32) -> (i32, i32, i32) {
    %c0_i32 = arith.constant 0 : i32
    %c0_i32_0 = arith.constant 0 : i32
    %c0_i32_1 = arith.constant 0 : i32
    return %arg0, %c0_i32, %c0_i32_0 : i32, i32, i32
  }
  func.func @transform_4(%arg0: i32) -> (i32, i32, i32) {
    %c0_i32 = arith.constant 0 : i32
    %c0_i32_0 = arith.constant 0 : i32
    %c0_i32_1 = arith.constant 0 : i32
    return %arg0, %c0_i32, %c0_i32_0 : i32, i32, i32
  }
  func.func @transform_5(%arg0: i32) -> (i32, i32, i32) {
    %c0_i32 = arith.constant 0 : i32
    %c0_i32_0 = arith.constant 0 : i32
    %c0_i32_1 = arith.constant 0 : i32
    return %arg0, %c0_i32, %c0_i32_0 : i32, i32, i32
  }
  func.func @transform_6(%arg0: i32) -> (i32, i32, i32) {
    %c0_i32 = arith.constant 0 : i32
    %c0_i32_0 = arith.constant 0 : i32
    %c0_i32_1 = arith.constant 0 : i32
    return %arg0, %c0_i32, %c0_i32_0 : i32, i32, i32
  }
  func.func @transform_7(%arg0: i32) -> (i32, i32, i32) {
    %c0_i32 = arith.constant 0 : i32
    %c0_i32_0 = arith.constant 0 : i32
    %c0_i32_1 = arith.constant 0 : i32
    return %arg0, %c0_i32, %c0_i32_0 : i32, i32, i32
  }
}

module attributes {stable_mosaic.version = 11 : i64} {
  func.func @_loss_enqueue_kernel(%arg0: memref<1xi32, #tpu.memory_space<smem>>, %arg1: memref<8x128xf32, #tpu.memory_space<vmem>>, %arg2: memref<8x128xf32, #tpu.memory_space<vmem>>, %arg3: memref<64x128xf32, #tpu.memory_space<any>>, %arg4: memref<1x1xf32, #tpu.memory_space<smem>>, %arg5: memref<64x128xf32, #tpu.memory_space<any>>, %arg6: memref<64x128xf32, #tpu.memory_space<vmem>>, %arg7: memref<2x!tpu.dma_semaphore, #tpu.memory_space<semaphore_mem>>) attributes {dimension_semantics = [], scalar_prefetch = 0 : i64, scratch_operands = 2 : i64, tpu.core_type = #tpu.core_type<tc>} {
    %c0_i32 = arith.constant 0 : i32
    %0 = tpu.memref_slice %arg7[%c0_i32] : memref<2x!tpu.dma_semaphore, #tpu.memory_space<semaphore_mem>> -> memref<1x!tpu.dma_semaphore, #tpu.memory_space<semaphore_mem>>
    %1 = tpu.memref_squeeze %0 : memref<1x!tpu.dma_semaphore, #tpu.memory_space<semaphore_mem>> -> memref<!tpu.dma_semaphore, #tpu.memory_space<semaphore_mem>>
    tpu.enqueue_dma source(%arg3 : memref<64x128xf32, #tpu.memory_space<any>>) target(%arg6 : memref<64x128xf32, #tpu.memory_space<vmem>>) target_semaphore(%1 : memref<!tpu.dma_semaphore, #tpu.memory_space<semaphore_mem>>)
    %c0_i32_0 = arith.constant 0 : i32
    %2 = tpu.memref_slice %arg7[%c0_i32_0] : memref<2x!tpu.dma_semaphore, #tpu.memory_space<semaphore_mem>> -> memref<1x!tpu.dma_semaphore, #tpu.memory_space<semaphore_mem>>
    %3 = tpu.memref_squeeze %2 : memref<1x!tpu.dma_semaphore, #tpu.memory_space<semaphore_mem>> -> memref<!tpu.dma_semaphore, #tpu.memory_space<semaphore_mem>>
    tpu.wait_dma2 semaphore(%3 : memref<!tpu.dma_semaphore, #tpu.memory_space<semaphore_mem>>) src(%arg3 : memref<64x128xf32, #tpu.memory_space<any>>) dst(%arg6 : memref<64x128xf32, #tpu.memory_space<vmem>>)
    %c0 = arith.constant 0 : index
    %c0_1 = arith.constant 0 : index
    %4 = vector.load %arg1[%c0, %c0_1] : memref<8x128xf32, #tpu.memory_space<vmem>>, vector<8x128xf32>
    %c0_2 = arith.constant 0 : index
    %c0_3 = arith.constant 0 : index
    %5 = vector.load %arg2[%c0_2, %c0_3] : memref<8x128xf32, #tpu.memory_space<vmem>>, vector<8x128xf32>
    %6 = arith.mulf %4, %5 : vector<8x128xf32>
    %cst = arith.constant dense<0.000000e+00> : vector<8xf32>
    %7 = vector.multi_reduction <add>, %6, %cst [1] : vector<8x128xf32> to vector<8xf32>
    %8 = vector.shape_cast %7 : vector<8xf32> to vector<8x1xf32>
    %cst_4 = arith.constant 14.2857141 : f32
    %9 = vector.broadcast %cst_4 : f32 to vector<8x1xf32>
    %10 = arith.mulf %8, %9 : vector<8x1xf32>
    %c0_5 = arith.constant 0 : index
    %c0_6 = arith.constant 0 : index
    %11 = vector.load %arg6[%c0_5, %c0_6] : memref<64x128xf32, #tpu.memory_space<vmem>>, vector<64x128xf32>
    %cst_7 = arith.constant dense<0.000000e+00> : vector<8x64xf32>
    %12 = tpu.matmul %4, %11, %cst_7 {dimension_numbers = #tpu.dot_dimension_numbers<[1], [1], [0], [0], [0, 0, 1, 0], [], []>} : vector<8x128xf32>, vector<64x128xf32>, vector<8x64xf32> -> vector<8x64xf32>
    %cst_8 = arith.constant 14.2857141 : f32
    %13 = vector.broadcast %cst_8 : f32 to vector<8x64xf32>
    %14 = arith.mulf %12, %13 : vector<8x64xf32>
    %cst_9 = arith.constant dense<0xFF800000> : vector<8xf32>
    %15 = vector.multi_reduction <maximumf>, %14, %cst_9 [1] : vector<8x64xf32> to vector<8xf32>
    %16 = vector.shape_cast %15 : vector<8xf32> to vector<8x1xf32>
    %17 = arith.maximumf %16, %10 : vector<8x1xf32>
    %18 = arith.subf %10, %17 : vector<8x1xf32>
    %19 = math.exp %18 : vector<8x1xf32>
    %20 = vector.broadcast %17 : vector<8x1xf32> to vector<8x64xf32>
    %21 = arith.subf %14, %20 : vector<8x64xf32>
    %22 = math.exp %21 : vector<8x64xf32>
    %cst_10 = arith.constant dense<0.000000e+00> : vector<8xf32>
    %23 = vector.multi_reduction <add>, %22, %cst_10 [1] : vector<8x64xf32> to vector<8xf32>
    %24 = vector.shape_cast %23 : vector<8xf32> to vector<8x1xf32>
    %25 = arith.addf %19, %24 : vector<8x1xf32>
    %26 = math.log %25 : vector<8x1xf32>
    %27 = arith.addf %26, %17 : vector<8x1xf32>
    %28 = arith.subf %27, %10 : vector<8x1xf32>
    %29 = vector.shape_cast %28 : vector<8x1xf32> to vector<1x8x1xf32>
    %cst_11 = arith.constant dense<0.000000e+00> : vector<1xf32>
    %30 = vector.multi_reduction <add>, %29, %cst_11 [1, 2] : vector<1x8x1xf32> to vector<1xf32>
    %31 = vector.shape_cast %30 : vector<1xf32> to vector<1x1x1xf32>
    %32 = vector.extract %31[0, 0, 0] : f32 from vector<1x1x1xf32>
    %cst_12 = arith.constant 2.500000e-01 : f32
    %33 = arith.mulf %32, %cst_12 : f32
    %c0_13 = arith.constant 0 : index
    %c0_14 = arith.constant 0 : index
    %34 = memref.load %arg4[%c0_13, %c0_14] : memref<1x1xf32, #tpu.memory_space<smem>>
    memref.store %33, %arg4[%c0_13, %c0_14] : memref<1x1xf32, #tpu.memory_space<smem>>
    %c0_15 = arith.constant 0 : index
    %35 = memref.load %arg0[%c0_15] : memref<1xi32, #tpu.memory_space<smem>>
    %c4_i32 = arith.constant 4 : i32
    %36 = arith.addi %35, %c4_i32 : i32
    %c0_i32_16 = arith.constant 0 : i32
    %c4_i32_17 = arith.constant 4 : i32
    %c0_i32_18 = arith.constant 0 : i32
    %37 = tpu.memref_slice %arg2[%c4_i32_17, %c0_i32_18] : memref<8x128xf32, #tpu.memory_space<vmem>> -> memref<4x128xf32, #tpu.memory_space<vmem>>
    %c0_i32_19 = arith.constant 0 : i32
    %38 = tpu.memref_slice %arg5[%35, %c0_i32_19] : memref<64x128xf32, #tpu.memory_space<any>> -> memref<4x128xf32, #tpu.memory_space<any>>
    %39 = tpu.memref_slice %arg7[%c0_i32_16] : memref<2x!tpu.dma_semaphore, #tpu.memory_space<semaphore_mem>> -> memref<1x!tpu.dma_semaphore, #tpu.memory_space<semaphore_mem>>
    %40 = tpu.memref_squeeze %39 : memref<1x!tpu.dma_semaphore, #tpu.memory_space<semaphore_mem>> -> memref<!tpu.dma_semaphore, #tpu.memory_space<semaphore_mem>>
    tpu.enqueue_dma source(%37 : memref<4x128xf32, #tpu.memory_space<vmem>>) target(%38 : memref<4x128xf32, #tpu.memory_space<any>>) target_semaphore(%40 : memref<!tpu.dma_semaphore, #tpu.memory_space<semaphore_mem>>)
    %c1_i32 = arith.constant 1 : i32
    %c0_i32_20 = arith.constant 0 : i32
    %c0_i32_21 = arith.constant 0 : i32
    %41 = tpu.memref_slice %arg2[%c0_i32_20, %c0_i32_21] : memref<8x128xf32, #tpu.memory_space<vmem>> -> memref<4x128xf32, #tpu.memory_space<vmem>>
    %c0_i32_22 = arith.constant 0 : i32
    %42 = tpu.memref_slice %arg5[%36, %c0_i32_22] : memref<64x128xf32, #tpu.memory_space<any>> -> memref<4x128xf32, #tpu.memory_space<any>>
    %43 = tpu.memref_slice %arg7[%c1_i32] : memref<2x!tpu.dma_semaphore, #tpu.memory_space<semaphore_mem>> -> memref<1x!tpu.dma_semaphore, #tpu.memory_space<semaphore_mem>>
    %44 = tpu.memref_squeeze %43 : memref<1x!tpu.dma_semaphore, #tpu.memory_space<semaphore_mem>> -> memref<!tpu.dma_semaphore, #tpu.memory_space<semaphore_mem>>
    tpu.enqueue_dma source(%41 : memref<4x128xf32, #tpu.memory_space<vmem>>) target(%42 : memref<4x128xf32, #tpu.memory_space<any>>) target_semaphore(%44 : memref<!tpu.dma_semaphore, #tpu.memory_space<semaphore_mem>>)
    %c0_i32_23 = arith.constant 0 : i32
    %c4_i32_24 = arith.constant 4 : i32
    %c0_i32_25 = arith.constant 0 : i32
    %45 = tpu.memref_slice %arg2[%c4_i32_24, %c0_i32_25] : memref<8x128xf32, #tpu.memory_space<vmem>> -> memref<4x128xf32, #tpu.memory_space<vmem>>
    %c0_i32_26 = arith.constant 0 : i32
    %46 = tpu.memref_slice %arg5[%35, %c0_i32_26] : memref<64x128xf32, #tpu.memory_space<any>> -> memref<4x128xf32, #tpu.memory_space<any>>
    %47 = tpu.memref_slice %arg7[%c0_i32_23] : memref<2x!tpu.dma_semaphore, #tpu.memory_space<semaphore_mem>> -> memref<1x!tpu.dma_semaphore, #tpu.memory_space<semaphore_mem>>
    %48 = tpu.memref_squeeze %47 : memref<1x!tpu.dma_semaphore, #tpu.memory_space<semaphore_mem>> -> memref<!tpu.dma_semaphore, #tpu.memory_space<semaphore_mem>>
    tpu.wait_dma2 semaphore(%48 : memref<!tpu.dma_semaphore, #tpu.memory_space<semaphore_mem>>) src(%45 : memref<4x128xf32, #tpu.memory_space<vmem>>) dst(%46 : memref<4x128xf32, #tpu.memory_space<any>>)
    %c1_i32_27 = arith.constant 1 : i32
    %c0_i32_28 = arith.constant 0 : i32
    %c0_i32_29 = arith.constant 0 : i32
    %49 = tpu.memref_slice %arg2[%c0_i32_28, %c0_i32_29] : memref<8x128xf32, #tpu.memory_space<vmem>> -> memref<4x128xf32, #tpu.memory_space<vmem>>
    %c0_i32_30 = arith.constant 0 : i32
    %50 = tpu.memref_slice %arg5[%36, %c0_i32_30] : memref<64x128xf32, #tpu.memory_space<any>> -> memref<4x128xf32, #tpu.memory_space<any>>
    %51 = tpu.memref_slice %arg7[%c1_i32_27] : memref<2x!tpu.dma_semaphore, #tpu.memory_space<semaphore_mem>> -> memref<1x!tpu.dma_semaphore, #tpu.memory_space<semaphore_mem>>
    %52 = tpu.memref_squeeze %51 : memref<1x!tpu.dma_semaphore, #tpu.memory_space<semaphore_mem>> -> memref<!tpu.dma_semaphore, #tpu.memory_space<semaphore_mem>>
    tpu.wait_dma2 semaphore(%52 : memref<!tpu.dma_semaphore, #tpu.memory_space<semaphore_mem>>) src(%49 : memref<4x128xf32, #tpu.memory_space<vmem>>) dst(%50 : memref<4x128xf32, #tpu.memory_space<any>>)
    return
  }
}

</mosaic_0001>

<bundles_post_ra>
// kernel: moco_forward.3
= control target key start
LH: loop header
LB: loop body
LE: loop exit
PB: predicated region body
PF: predicated region fallthrough
CT: control target
= control target key end

     0   :  { %s75_s0 = inlined_call_operand.vmem [shape: f32[24,128], index: 0, kind: input, shape index: {}]   ;;  %s76_s1 = inlined_call_operand.vmem [shape: f32[24,128], index: 1, kind: input, shape index: {}]   ;;  %s77_s2 = inlined_call_operand.vmem [shape: f32[24,128], index: 2, kind: output, shape index: {}]  }
   0x1   :  { %v11_v0 = vld [vmem:[%s76_s1] sm:$0xff]  ;;  %v12_v2 = vld [vmem:[%s76_s1 + $0x8] sm:$0xff]  ;;  %v13_v7 = vld [vmem:[%s76_s1 + $0x10] sm:$0xff] }
   0x2   :  { %v17_v1 = vld [vmem:[%s75_s0] sm:$0xff]  ;;  %v14_v3 = vmul.f32 0.999, %v11_v0  ;;  %v15_v5 = vmul.f32 0.999, %v12_v2  ;;  %v18_v6 = vld [vmem:[%s75_s0 + $0x8] sm:$0xff] }
   0x3   :  { %v20_v4 = vmul.f32 0.001, %v17_v1  ;;  %v19_v8 = vld [vmem:[%s75_s0 + $0x10] sm:$0xff]  ;;  %v21_v10 = vmul.f32 0.001, %v18_v6 }
   0x4   :  { %v16_v11 = vmul.f32 0.999, %v13_v7  ;;  %v22_v12 = vmul.f32 0.001, %v19_v8 }
   0x5   :  { %v23_v9 = vadd.f32 %v20_v4, %v14_v3  ;;  %v24_v13 = vadd.f32 %v21_v10, %v15_v5 }
   0x6   :  { %v25_v14 = vadd.f32 %v22_v12, %v16_v11 }
   0x7   :  { %26 = vst [vmem:[%s77_s2] sm:$0xff] %v23_v9 }
   0x8   :  { %27 = vst [vmem:[%s77_s2 + $0x8] sm:$0xff] %v24_v13 }
   0x9   :  { %28 = vst [vmem:[%s77_s2 + $0x10] sm:$0xff] %v25_v14 }

// kernel: moco_forward.4
= control target key start
LH: loop header
LB: loop body
LE: loop exit
PB: predicated region body
PF: predicated region fallthrough
CT: control target
= control target key end

     0   :  { %s1133_s24 = smov 0   ;;  %s1422_s0 = inlined_call_operand.vmem [shape: f32[2,512,128], index: 0, kind: input, shape index: {}]   ;;  %s1423_s1 = inlined_call_operand.vmem [shape: f32[8,512], index: 1, kind: input, shape index: {}]   ;;  %s1424_s2 = inlined_call_operand.vmem [shape: f32[2,128,128], index: 2, kind: input, shape index: {}]   ;;  %s1425_s3 = inlined_call_operand.vmem [shape: f32[2,128,128], index: 3, kind: input, shape index: {}]   ;;  %s1426_s4 = inlined_call_operand.vmem [shape: f32[2,1,128], index: 4, kind: input, shape index: {}]   ;;  %s1427_s5 = inlined_call_operand.vmem [shape: f32[2,128,128], index: 5, kind: input, shape index: {}]   ;;  %s1428_s6 = inlined_call_operand.vmem [shape: f32[2,1,128], index: 6, kind: input, shape index: {}]   ;;  %s1429_s7 = inlined_call_operand.vmem [shape: f32[2,8,128], index: 7, kind: output, shape index: {}]  }
   0x1 LB: > { %s1005_s25 = sadd.s32 4294967295, %s1091_s24   ;;  %p1009_p0 = scmp.ge.s32.totalorder %s1091_s24, 1  ;;  %s1091_s24 = sphi %s1133_s24, %s17_s24  }
   0x2   : > { %p283_p1 = scmp.lt.s32.totalorder %s1091_s24, 3 }
   0x4   : > { %p284_p2 = pnand %p1009_p0, %p283_p1 }
   0x5   : > { %p335_p3 = scmp.lt.s32.totalorder (!%p284_p2), %s1005_s25, 1 }
   0x6   : > { %287 = sbr.rel (%p284_p2) target bundleno = 894 (0x37e), region = 48 }
   0xb   : > { %s1431_s25 = smov (!%p335_p3, %s1005_s25), 1 }
   0xc   : > { %s1144_s26 = sshll.u32 %s1431_s25, 7  ;;  %s1021_s30 = sshll.u32 %s1431_s25, 9 }
   0xd   : > { %s1150_s29 = scalar_lea.vmem %s1424_s2, %s1144_s26  ;;  %s1170_s10 = scalar_lea.vmem %s1422_s0, %s1021_s30 }
   0xe   : > { %v444_v0 = vld [vmem:[%s1150_s29 + $0x78] sm:$0xff]  ;;  %v443_v1 = vld [vmem:[%s1150_s29 + $0x70] sm:$0xff]  ;;  %v442_v2 = vld [vmem:[%s1150_s29 + $0x68] sm:$0xff]  ;;  %s1345_s17 = scalar_lea.vmem %s1425_s3, %s1144_s26  ;;  %s352_s27 = scalar_lea.vmem %s1426_s4, %s1431_s25 }
   0xf   : > { %445 = vmatpush.msra.mxu0 %v444_v0  ;;  %1025 = vmatpush.msra.mxu1 %v444_v0  ;;  %v441_v3 = vld [vmem:[%s1150_s29 + $0x60] sm:$0xff]  ;;  %v440_v4 = vld [vmem:[%s1150_s29 + $0x58] sm:$0xff]  ;;  %v439_v5 = vld [vmem:[%s1150_s29 + $0x50] sm:$0xff]  ;;  %s1387_s30 = scalar_lea.vmem %s1427_s5, %s1144_s26  ;;  %s360_s9 = scalar_lea.vmem %s1428_s6, %s1431_s25 }
  0x10   : > { %1026 = vmatpush.msra.mxu2 %v444_v0  ;;  %1027 = vmatpush.msra.mxu3 %v444_v0  ;;  %v438_v6 = vld [vmem:[%s1150_s29 + $0x48] sm:$0xff]  ;;  %v437_v7 = vld [vmem:[%s1150_s29 + $0x40] sm:$0xff]  ;;  %v436_v8 = vld [vmem:[%s1150_s29 + $0x38] sm:$0xff]  ;;  %s1018_s12 = sshll.u32 %s1431_s25, 3 }
  0x11   : > { %446 = vmatpush.msra.mxu0 %v443_v1  ;;  %1028 = vmatpush.msra.mxu1 %v443_v1  ;;  %v435_v9 = vld [vmem:[%s1150_s29 + $0x30] sm:$0xff]  ;;  %v434_v10 = vld [vmem:[%s1150_s29 + $0x28] sm:$0xff]  ;;  %v433_v11 = vld [vmem:[%s1150_s29 + $0x20] sm:$0xff]  ;;  %s364_s15 = scalar_lea.vmem %s1429_s7, %s1018_s12 }
  0x12   : > { %1029 = vmatpush.msra.mxu2 %v443_v1  ;;  %1030 = vmatpush.msra.mxu3 %v443_v1  ;;  %v432_v12 = vld [vmem:[%s1150_s29 + $0x18] sm:$0xff]  ;;  %v431_v13 = vld [vmem:[%s1150_s29 + $0x10] sm:$0xff]  ;;  %v430_v14 = vld [vmem:[%s1150_s29 + $0x8] sm:$0xff] }
  0x13   : > { %447 = vmatpush.msra.mxu0 %v442_v2  ;;  %1031 = vmatpush.msra.mxu1 %v442_v2  ;;  %v429_v15 = vld [vmem:[%s1150_s29] sm:$0xff]  ;;  %v400_v18 = vld [vmem:[%s1170_s10 + $0x118] sm:$0xff]  ;;  %v366_v19 = vld [vmem:[%s1170_s10 + $0x8] sm:$0xff] }
  0x14   : > { %1032 = vmatpush.msra.mxu2 %v442_v2  ;;  %1033 = vmatpush.msra.mxu3 %v442_v2  ;;  %v365_v16 = vld [vmem:[%s1170_s10] sm:$0xff]  ;;  %v386_v20 = vld [vmem:[%s1170_s10 + $0xa8] sm:$0xff]  ;;  %v415_v22 = vld [vmem:[%s1170_s10 + $0x190] sm:$0xff] }
  0x15   : > { %448 = vmatpush.msra.mxu0 %v441_v3  ;;  %1034 = vmatpush.msra.mxu1 %v441_v3  ;;  %v385_v17 = vld [vmem:[%s1170_s10 + $0xa0] sm:$0xff]  ;;  %v367_v23 = vld [vmem:[%s1170_s10 + $0x10] sm:$0xff]  ;;  %v402_v25 = vld [vmem:[%s1170_s10 + $0x128] sm:$0xff] }
  0x16   : > { %1035 = vmatpush.msra.mxu2 %v441_v3  ;;  %1036 = vmatpush.msra.mxu3 %v441_v3  ;;  %v401_v21 = vld [vmem:[%s1170_s10 + $0x120] sm:$0xff]  ;;  %v387_v24 = vld [vmem:[%s1170_s10 + $0xb0] sm:$0xff]  ;;  %v416_v26 = vld [vmem:[%s1170_s10 + $0x198] sm:$0xff] }
  0x17   : > { %449 = vmatpush.msra.mxu0 %v440_v4  ;;  %1037 = vmatpush.msra.mxu1 %v440_v4  ;;  %v368_v27 = vld [vmem:[%s1170_s10 + $0x18] sm:$0xff]  ;;  %v403_v29 = vld [vmem:[%s1170_s10 + $0x130] sm:$0xff]  ;;  %v417_v30 = vld [vmem:[%s1170_s10 + $0x1a0] sm:$0xff] }
  0x18   : > { %1038 = vmatpush.msra.mxu2 %v440_v4  ;;  %1039 = vmatpush.msra.mxu3 %v440_v4  ;;  %v388_v28 = vld [vmem:[%s1170_s10 + $0xb8] sm:$0xff]  ;;  %v369_v31 = vld [vmem:[%s1170_s10 + $0x20] sm:$0xff]  ;;  %v418_v34 = vld [vmem:[%s1170_s10 + $0x1a8] sm:$0xff] }
  0x19   : > { %450 = vmatpush.msra.mxu0 %v439_v5  ;;  %1040 = vmatpush.msra.mxu1 %v439_v5  ;;  %v389_v32 = vld [vmem:[%s1170_s10 + $0xc0] sm:$0xff]  ;;  %v404_v33 = vld [vmem:[%s1170_s10 + $0x138] sm:$0xff]  ;;  %v370_v35 = vld [vmem:[%s1170_s10 + $0x28] sm:$0xff] }
  0x1a   : > { %1041 = vmatpush.msra.mxu2 %v439_v5  ;;  %1042 = vmatpush.msra.mxu3 %v439_v5  ;;  %v390_v36 = vld [vmem:[%s1170_s10 + $0xc8] sm:$0xff]  ;;  %v405_v37 = vld [vmem:[%s1170_s10 + $0x140] sm:$0xff]  ;;  %v419_v38 = vld [vmem:[%s1170_s10 + $0x1b0] sm:$0xff] }
  0x1b   : > { %451 = vmatpush.msra.mxu0 %v438_v6  ;;  %1043 = vmatpush.msra.mxu1 %v438_v6  ;;  %v371_v39 = vld [vmem:[%s1170_s10 + $0x30] sm:$0xff]  ;;  %v406_v41 = vld [vmem:[%s1170_s10 + $0x148] sm:$0xff]  ;;  %v420_v42 = vld [vmem:[%s1170_s10 + $0x1b8] sm:$0xff] }
  0x1c   : > { %1044 = vmatpush.msra.mxu2 %v438_v6  ;;  %1045 = vmatpush.msra.mxu3 %v438_v6  ;;  %v391_v40 = vld [vmem:[%s1170_s10 + $0xd0] sm:$0xff]  ;;  %v372_v43 = vld [vmem:[%s1170_s10 + $0x38] sm:$0xff]  ;;  %v421_v46 = vld [vmem:[%s1170_s10 + $0x1c0] sm:$0xff] }
  0x1d   : > { %452 = vmatpush.msra.mxu0 %v437_v7  ;;  %1046 = vmatpush.msra.mxu1 %v437_v7  ;;  %v392_v44 = vld [vmem:[%s1170_s10 + $0xd8] sm:$0xff]  ;;  %v407_v45 = vld [vmem:[%s1170_s10 + $0x150] sm:$0xff]  ;;  %v373_v47 = vld [vmem:[%s1170_s10 + $0x40] sm:$0xff] }
  0x1e   : > { %1047 = vmatpush.msra.mxu2 %v437_v7  ;;  %1048 = vmatpush.msra.mxu3 %v437_v7  ;;  %v393_v48 = vld [vmem:[%s1170_s10 + $0xe0] sm:$0xff]  ;;  %v408_v49 = vld [vmem:[%s1170_s10 + $0x158] sm:$0xff]  ;;  %v422_v50 = vld [vmem:[%s1170_s10 + $0x1c8] sm:$0xff] }
  0x1f   : > { %453 = vmatpush.msra.mxu0 %v436_v8  ;;  %1049 = vmatpush.msra.mxu1 %v436_v8  ;;  %v374_v51 = vld [vmem:[%s1170_s10 + $0x48] sm:$0xff]  ;;  %v409_v53 = vld [vmem:[%s1170_s10 + $0x160] sm:$0xff]  ;;  %v423_v54 = vld [vmem:[%s1170_s10 + $0x1d0] sm:$0xff] }
  0x20   : > { %1050 = vmatpush.msra.mxu2 %v436_v8  ;;  %1051 = vmatpush.msra.mxu3 %v436_v8  ;;  %v394_v52 = vld [vmem:[%s1170_s10 + $0xe8] sm:$0xff]  ;;  %v375_v55 = vld [vmem:[%s1170_s10 + $0x50] sm:$0xff]  ;;  %v424_v58 = vld [vmem:[%s1170_s10 + $0x1d8] sm:$0xff] }
  0x21   : > { %454 = vmatpush.msra.mxu0 %v435_v9  ;;  %1052 = vmatpush.msra.mxu1 %v435_v9  ;;  %v395_v56 = vld [vmem:[%s1170_s10 + $0xf0] sm:$0xff]  ;;  %v410_v57 = vld [vmem:[%s1170_s10 + $0x168] sm:$0xff]  ;;  %v376_v59 = vld [vmem:[%s1170_s10 + $0x58] sm:$0xff] }
  0x22   : > { %1053 = vmatpush.msra.mxu2 %v435_v9  ;;  %1054 = vmatpush.msra.mxu3 %v435_v9  ;;  %v396_v60 = vld [vmem:[%s1170_s10 + $0xf8] sm:$0xff]  ;;  %v411_v61 = vld [vmem:[%s1170_s10 + $0x170] sm:$0xff]  ;;  %v425_v62 = vld [vmem:[%s1170_s10 + $0x1e0] sm:$0xff] }
  0x23   : > { %455 = vmatpush.msra.mxu0 %v434_v10  ;;  %1055 = vmatpush.msra.mxu1 %v434_v10  ;;  %v377_v63 = vld [vmem:[%s1170_s10 + $0x60] sm:$0xff]  ;;  %v412_v0 = vld [vmem:[%s1170_s10 + $0x178] sm:$0xff]  ;;  %v426_v1 = vld [vmem:[%s1170_s10 + $0x1e8] sm:$0xff] }
  0x24   : > { %1056 = vmatpush.msra.mxu2 %v434_v10  ;;  %1057 = vmatpush.msra.mxu3 %v434_v10  ;;  %v378_v2 = vld [vmem:[%s1170_s10 + $0x68] sm:$0xff]  ;;  %v397_v3 = vld [vmem:[%s1170_s10 + $0x100] sm:$0xff]  ;;  %v427_v4 = vld [vmem:[%s1170_s10 + $0x1f0] sm:$0xff] }
  0x25   : > { %456 = vmatpush.msra.mxu0 %v433_v11  ;;  %1058 = vmatpush.msra.mxu1 %v433_v11  ;;  %v379_v5 = vld [vmem:[%s1170_s10 + $0x70] sm:$0xff]  ;;  %v398_v6 = vld [vmem:[%s1170_s10 + $0x108] sm:$0xff]  ;;  %v428_v7 = vld [vmem:[%s1170_s10 + $0x1f8] sm:$0xff] }
  0x26   : > { %1059 = vmatpush.msra.mxu2 %v433_v11  ;;  %1060 = vmatpush.msra.mxu3 %v433_v11  ;;  %v380_v8 = vld [vmem:[%s1170_s10 + $0x78] sm:$0xff]  ;;  %v399_v9 = vld [vmem:[%s1170_s10 + $0x110] sm:$0xff]  ;;  %v381_v11 = vld [vmem:[%s1170_s10 + $0x80] sm:$0xff] }
  0x27   : > { %457 = vmatpush.msra.mxu0 %v432_v12  ;;  %1061 = vmatpush.msra.mxu1 %v432_v12 }
  0x28   : > { %1062 = vmatpush.msra.mxu2 %v432_v12  ;;  %1063 = vmatpush.msra.mxu3 %v432_v12 }
  0x29   : > { %458 = vmatpush.msra.mxu0 %v431_v13  ;;  %1064 = vmatpush.msra.mxu1 %v431_v13 }
  0x2a   : > { %1065 = vmatpush.msra.mxu2 %v431_v13  ;;  %1066 = vmatpush.msra.mxu3 %v431_v13 }
  0x2b   : > { %459 = vmatpush.msra.mxu0 %v430_v14  ;;  %1067 = vmatpush.msra.mxu1 %v430_v14 }
  0x2c   : > { %1068 = vmatpush.msra.mxu2 %v430_v14  ;;  %1069 = vmatpush.msra.mxu3 %v430_v14 }
  0x2d   : > { %460 = vmatpush.msra.mxu0 %v429_v15  ;;  %1070 = vmatpush.msra.mxu1 %v429_v15 }
  0x2e   : > { %1071 = vmatpush.msra.mxu2 %v429_v15  ;;  %461 = vmatmul.f32.vlgmr.msra.gmra.mxu0 %v365_v16  ;;  %v413_v16 = vld [vmem:[%s1170_s10 + $0x180] sm:$0xff] }
  0x2f   : > { %521 = vmatmul.f32.vlgmr.msra.gmra.mxu1 %v385_v17  ;;  %566 = vmatmul.f32.vlgmr.msra.gmra.mxu2 %v400_v18 }
  0x30   : > { %1072 = vmatpush.msra.mxu3 %v429_v15  ;;  %v382_v15 = vld [vmem:[%s1170_s10 + $0x88] sm:$0xff] }
  0x31   : > { %611 = vmatmul.f32.vlgmr.msra.gmra.mxu3 %v415_v22 }
  0x36   : > { %464 = vmatmul.f32.gmra.mxu0 %v366_v19 }
  0x37   : > { %524 = vmatmul.f32.gmra.mxu1 %v386_v20  ;;  %569 = vmatmul.f32.gmra.mxu2 %v401_v21  ;;  %v383_v20 = vld [vmem:[%s1170_s10 + $0x90] sm:$0xff]  ;;  %v414_v21 = vld [vmem:[%s1170_s10 + $0x188] sm:$0xff] }
  0x39   : > { %614 = vmatmul.f32.gmra.mxu3 %v416_v26  ;;  %v384_v26 = vld [vmem:[%s1170_s10 + $0x98] sm:$0xff] }
  0x3e   : > { %467 = vmatmul.f32.gmra.mxu0 %v367_v23 }
  0x3f   : > { %527 = vmatmul.f32.gmra.mxu1 %v387_v24  ;;  %572 = vmatmul.f32.gmra.mxu2 %v402_v25 }
  0x41   : > { %617 = vmatmul.f32.gmra.mxu3 %v417_v30 }
  0x46   : > { %470 = vmatmul.f32.gmra.mxu0 %v368_v27 }
  0x47   : > { %530 = vmatmul.f32.gmra.mxu1 %v388_v28  ;;  %575 = vmatmul.f32.gmra.mxu2 %v403_v29 }
  0x49   : > { %620 = vmatmul.f32.gmra.mxu3 %v418_v34 }
  0x4e   : > { %473 = vmatmul.f32.gmra.mxu0 %v369_v31 }
  0x4f   : > { %533 = vmatmul.f32.gmra.mxu1 %v389_v32  ;;  %578 = vmatmul.f32.gmra.mxu2 %v404_v33 }
  0x51   : > { %623 = vmatmul.f32.gmra.mxu3 %v419_v38 }
  0x56   : > { %476 = vmatmul.f32.gmra.mxu0 %v370_v35 }
  0x57   : > { %536 = vmatmul.f32.gmra.mxu1 %v390_v36  ;;  %581 = vmatmul.f32.gmra.mxu2 %v405_v37 }
  0x59   : > { %626 = vmatmul.f32.gmra.mxu3 %v420_v42 }
  0x5e   : > { %479 = vmatmul.f32.gmra.mxu0 %v371_v39 }
  0x5f   : > { %539 = vmatmul.f32.gmra.mxu1 %v391_v40  ;;  %584 = vmatmul.f32.gmra.mxu2 %v406_v41 }
  0x61   : > { %629 = vmatmul.f32.gmra.mxu3 %v421_v46 }
  0x66   : > { %482 = vmatmul.f32.gmra.mxu0 %v372_v43 }
  0x67   : > { %542 = vmatmul.f32.gmra.mxu1 %v392_v44  ;;  %587 = vmatmul.f32.gmra.mxu2 %v407_v45 }
  0x69   : > { %632 = vmatmul.f32.gmra.mxu3 %v422_v50 }
  0x6e   : > { %485 = vmatmul.f32.gmra.mxu0 %v373_v47 }
  0x6f   : > { %545 = vmatmul.f32.gmra.mxu1 %v393_v48  ;;  %590 = vmatmul.f32.gmra.mxu2 %v408_v49 }
  0x71   : > { %635 = vmatmul.f32.gmra.mxu3 %v423_v54 }
  0x76   : > { %488 = vmatmul.f32.gmra.mxu0 %v374_v51 }
  0x77   : > { %548 = vmatmul.f32.gmra.mxu1 %v394_v52  ;;  %593 = vmatmul.f32.gmra.mxu2 %v409_v53 }
  0x79   : > { %638 = vmatmul.f32.gmra.mxu3 %v424_v58 }
  0x7e   : > { %491 = vmatmul.f32.gmra.mxu0 %v375_v55 }
  0x7f   : > { %551 = vmatmul.f32.gmra.mxu1 %v395_v56  ;;  %596 = vmatmul.f32.gmra.mxu2 %v410_v57 }
  0x81   : > { %641 = vmatmul.f32.gmra.mxu3 %v425_v62 }
  0x86   : > { %494 = vmatmul.f32.gmra.mxu0 %v376_v59 }
  0x87   : > { %554 = vmatmul.f32.gmra.mxu1 %v396_v60  ;;  %599 = vmatmul.f32.gmra.mxu2 %v411_v61 }
  0x89   : > { %644 = vmatmul.f32.gmra.mxu3 %v426_v1 }
  0x8e   : > { %497 = vmatmul.f32.gmra.mxu0 %v377_v63 }
  0x8f   : > { %602 = vmatmul.f32.gmra.mxu2 %v412_v0  ;;  %557 = vmatmul.f32.gmra.mxu1 %v397_v3 }
  0x91   : > { %647 = vmatmul.f32.gmra.mxu3 %v427_v4 }
  0x96   : > { %500 = vmatmul.f32.gmra.mxu0 %v378_v2 }
  0x97   : > { %560 = vmatmul.f32.gmra.mxu1 %v398_v6  ;;  %605 = vmatmul.f32.gmra.mxu2 %v413_v16 }
  0x99   : > { %650 = vmatmul.f32.gmra.mxu3 %v428_v7 }
  0x9e   : > { %503 = vmatmul.f32.gmra.mxu0 %v379_v5 }
  0x9f   : > { %563 = vmatmul.f32.gmra.mxu1 %v399_v9  ;;  %608 = vmatmul.f32.gmra.mxu2 %v414_v21 }
  0xa6   : > { %506 = vmatmul.f32.gmra.mxu0 %v380_v8 }
  0xab   : > { %v1232_v10 = vpop.f32.mrf.mxu0 }
  0xac   : > { %v1235_v12 = vpop.f32.mrf.mxu1 }
  0xae   : > { %509 = vmatmul.f32.gmra.mxu0 %v381_v11 }
  0xb2   : > { %v1237_v13 = vpop.f32.mrf.mxu2 }
  0xb3   : > { %v1239_v14 = vpop.f32.mrf.mxu0 }
  0xb4   : > { %v1243_v17 = vpop.f32.mrf.mxu1  ;;  %v1253_v23 = vpop.f32.mrf.mxu3 }
  0xb6   : > { %512 = vmatmul.f32.gmra.mxu0 %v382_v15 }
  0xba   : > { %v1245_v18 = vpop.f32.mrf.mxu2 }
  0xbb   : > { %v1247_v19 = vpop.f32.mrf.mxu0 }
  0xbc   : > { %v1251_v22 = vpop.f32.mrf.mxu1  ;;  %v1262_v28 = vpop.f32.mrf.mxu3 }
  0xbd   : > { %v676_v21 = vmax.f32 %v1251_v22, 0.0 }
  0xbe   : > { %515 = vmatmul.f32.gmra.mxu0 %v383_v20 }
  0xc2   : > { %v1255_v24 = vpop.f32.mrf.mxu2 }
  0xc3   : > { %v1257_v25 = vpop.f32.mrf.mxu0 }
  0xc4   : > { %v1260_v27 = vpop.f32.mrf.mxu1  ;;  %v1268_v32 = vpop.f32.mrf.mxu3 }
  0xc5   : > { %v677_v15 = vmax.f32 %v1260_v27, 0.0 }
  0xc6   : > { %518 = vmatmul.f32.gmra.mxu0 %v384_v26 }
  0xca   : > { %v1264_v29 = vpop.f32.mrf.mxu2 }
  0xcb   : > { %v1266_v30 = vpop.f32.mrf.mxu0 }
  0xcc   : > { %v534_v31 = vpop.f32.mrf.mxu1  ;;  %v1276_v37 = vpop.f32.mrf.mxu3 }
  0xcd   : > { %v678_v6 = vmax.f32 %v534_v31, 0.0  ;;  %v675_v31 = vmax.f32 %v1243_v17, 0.0 }
  0xd2   : > { %v1270_v33 = vpop.f32.mrf.mxu2 }
  0xd3   : > { %v1272_v34 = vpop.f32.mrf.mxu0  ;;  %v693_v17 = vmax.f32 %v1270_v33, 0.0 }
  0xd4   : > { %v537_v35 = vpop.f32.mrf.mxu1  ;;  %v1284_v43 = vpop.f32.mrf.mxu3 }
  0xd5   : > { %v679_v4 = vmax.f32 %v537_v35, 0.0 }
  0xda   : > { %v1274_v36 = vpop.f32.mrf.mxu2 }
  0xdb   : > { %v1278_v38 = vpop.f32.mrf.mxu0 }
  0xdc   : > { %v540_v39 = vpop.f32.mrf.mxu1  ;;  %v1288_v47 = vpop.f32.mrf.mxu3 }
  0xdd   : > { %v680_v3 = vmax.f32 %v540_v39, 0.0  ;;  %v674_v39 = vmax.f32 %v1235_v12, 0.0 }
  0xe2   : > { %v1280_v40 = vpop.f32.mrf.mxu2 }
  0xe3   : > { %v1282_v41 = vpop.f32.mrf.mxu0 }
  0xe4   : > { %v543_v42 = vpop.f32.mrf.mxu1  ;;  %v1292_v51 = vpop.f32.mrf.mxu3 }
  0xe5   : > { %v681_v0 = vmax.f32 %v543_v42, 0.0 }
  0xea   : > { %v588_v44 = vpop.f32.mrf.mxu2 }
  0xeb   : > { %v1286_v45 = vpop.f32.mrf.mxu0  ;;  %v696_v42 = vmax.f32 %v588_v44, 0.0 }
  0xec   : > { %v546_v46 = vpop.f32.mrf.mxu1  ;;  %v1296_v56 = vpop.f32.mrf.mxu3 }
  0xed   : > { %v682_v62 = vmax.f32 %v546_v46, 0.0 }
  0xf2   : > { %v591_v48 = vpop.f32.mrf.mxu2 }
  0xf3   : > { %v1290_v49 = vpop.f32.mrf.mxu0  ;;  %v697_v35 = vmax.f32 %v591_v48, 0.0 }
  0xf4   : > { %v549_v50 = vpop.f32.mrf.mxu1  ;;  %v1302_v2 = vpop.f32.mrf.mxu3 }
  0xf5   : > { %v683_v61 = vmax.f32 %v549_v50, 0.0  ;;  %v695_v50 = vmax.f32 %v1280_v40, 0.0 }
  0xfa   : > { %v594_v52 = vpop.f32.mrf.mxu2 }
  0xfb   : > { %v1294_v53 = vpop.f32.mrf.mxu0  ;;  %v698_v26 = vmax.f32 %v594_v52, 0.0  ;;  %v694_v52 = vmax.f32 %v1274_v36, 0.0 }
  0xfc   : > { %v552_v54 = vpop.f32.mrf.mxu1  ;;  %v1307_v20 = vpop.f32.mrf.mxu3 }
  0xfd   : > { %v684_v59 = vmax.f32 %v552_v54, 0.0  ;;  %v692_v54 = vmax.f32 %v1264_v29, 0.0 }
 0x102   : > { %v597_v55 = vpop.f32.mrf.mxu2 }
 0x103   : > { %v1298_v57 = vpop.f32.mrf.mxu0  ;;  %v699_v16 = vmax.f32 %v597_v55, 0.0  ;;  %v691_v55 = vmax.f32 %v1255_v24, 0.0 }
 0x104   : > { %v555_v58 = vpop.f32.mrf.mxu1  ;;  %v1313_v22 = vpop.f32.mrf.mxu3 }
 0x105   : > { %v685_v60 = vmax.f32 %v555_v58, 0.0 }
 0x107   : > { %742 = vmatpush.msrb.mxu2 %v685_v60  ;;  %v689_v60 = vmax.f32 %v1237_v13, 0.0  ;;  %v662_v13 = vmax.f32 %v1286_v45, 0.0  ;;  %v658_v45 = vmax.f32 %v1266_v30, 0.0  ;;  %v718_v30 = vld [vmem:[%s1423_s1] sm:$0xff] }
 0x109   : > { %743 = vmatpush.msrb.mxu2 %v684_v59  ;;  %v690_v59 = vmax.f32 %v1245_v18, 0.0 }
 0x10a   : > { %v600_v63 = vpop.f32.mrf.mxu2 }
 0x10b   : > { %744 = vmatpush.msrb.mxu2 %v683_v61  ;;  %v1300_v1 = vpop.f32.mrf.mxu0  ;;  %v700_v7 = vmax.f32 %v600_v63, 0.0  ;;  %v664_v63 = vmax.f32 %v1294_v53, 0.0  ;;  %v659_v53 = vmax.f32 %v1272_v34, 0.0 }
 0x10c   : > { %v1304_v11 = vpop.f32.mrf.mxu1  ;;  %v666_v36 = vmax.f32 %v1300_v1, 0.0  ;;  %v645_v33 = vpop.f32.mrf.mxu3 }
 0x10d   : > { %745 = vmatpush.msrb.mxu2 %v682_v62  ;;  %v665_v62 = vmax.f32 %v1298_v57, 0.0  ;;  %v686_v18 = vmax.f32 %v1304_v11, 0.0  ;;  %v661_v57 = vmax.f32 %v1282_v41, 0.0  ;;  %v656_v41 = vmax.f32 %v1247_v19, 0.0 }
 0x10e   : > { %v715_v19 = vmax.f32 %v645_v33, 0.0  ;;  %v802_v33 = vld [vmem:[%s1345_s17] sm:$0xff] }
 0x10f   : > { %746 = vmatpush.msrb.mxu2 %v681_v0  ;;  %v663_v0 = vmax.f32 %v1290_v49, 0.0  ;;  %v720_v49 = vld [vmem:[%s1423_s1 + $0x10] sm:$0xff] }
 0x111   : > { %747 = vmatpush.msrb.mxu2 %v680_v3 }
 0x112   : > { %v603_v5 = vpop.f32.mrf.mxu2 }
 0x113   : > { %v701_v8 = vmax.f32 %v603_v5, 0.0  ;;  %748 = vmatpush.msrb.mxu2 %v679_v4  ;;  %v501_v9 = vpop.f32.mrf.mxu0  ;;  %v660_v4 = vmax.f32 %v1278_v38, 0.0 }
 0x114   : > { %v561_v46 = vpop.f32.mrf.mxu1  ;;  %v667_v40 = vmax.f32 %v501_v9, 0.0  ;;  %v648_v3 = vpop.f32.mrf.mxu3 }
 0x115   : > { %749 = vmatpush.msrb.mxu2 %v678_v6  ;;  %762 = vmatpush.msrb.mxu3 %v701_v8  ;;  %v687_v24 = vmax.f32 %v561_v46, 0.0  ;;  %v657_v6 = vmax.f32 %v1257_v25, 0.0  ;;  %v654_v8 = vmax.f32 %v1232_v10, 0.0  ;;  %v714_v10 = vmax.f32 %v1313_v22, 0.0  ;;  %v813_v22 = vld [vmem:[%s1345_s17 + $0x58] sm:$0xff] }
 0x117   : > { %750 = vmatpush.msrb.mxu2 %v677_v15  ;;  %763 = vmatpush.msrb.mxu3 %v700_v7  ;;  %v655_v7 = vmax.f32 %v1239_v14, 0.0  ;;  %v716_v15 = vmax.f32 %v648_v3, 0.0 }
 0x119   : > { %751 = vmatpush.msrb.mxu2 %v676_v21  ;;  %764 = vmatpush.msrb.mxu3 %v699_v16  ;;  %v719_v21 = vld [vmem:[%s1423_s1 + $0x8] sm:$0xff] }
 0x11a   : > { %v606_v46 = vpop.f32.mrf.mxu2 }
 0x11b   : > { %752 = vmatpush.msrb.mxu2 %v675_v31  ;;  %765 = vmatpush.msrb.mxu3 %v698_v26  ;;  %v504_v27 = vpop.f32.mrf.mxu0  ;;  %v713_v26 = vmax.f32 %v1307_v20, 0.0  ;;  %v817_v31 = vld [vmem:[%s1345_s17 + $0x78] sm:$0xff]  ;;  %v710_v20 = vmax.f32 %v1292_v51, 0.0  ;;  %v811_v51 = vld [vmem:[%s1345_s17 + $0x48] sm:$0xff] }
 0x11c   : > { %v668_v44 = vmax.f32 %v504_v27, 0.0  ;;  %v564_v58 = vpop.f32.mrf.mxu1  ;;  %v651_v38 = vpop.f32.mrf.mxu3  ;;  %v711_v27 = vmax.f32 %v1296_v56, 0.0  ;;  %v812_v56 = vld [vmem:[%s1345_s17 + $0x50] sm:$0xff] }
 0x11d   : > { %753 = vmatpush.msrb.mxu2 %v674_v39  ;;  %766 = vmatpush.msrb.mxu3 %v697_v35  ;;  %v688_v61 = vmax.f32 %v564_v58, 0.0  ;;  %v717_v34 = vmax.f32 %v651_v38, 0.0  ;;  %v712_v35 = vmax.f32 %v1302_v2, 0.0  ;;  %v816_v39 = vld [vmem:[%s1345_s17 + $0x70] sm:$0xff]  ;;  %v709_v2 = vmax.f32 %v1288_v47, 0.0  ;;  %v805_v58 = vld [vmem:[%s1345_s17 + $0x18] sm:$0xff] }
 0x11f   : > { %767 = vmatpush.msrb.mxu3 %v696_v42  ;;  %v815_v42 = vld [vmem:[%s1345_s17 + $0x68] sm:$0xff] }
 0x121   : > { %768 = vmatpush.msrb.mxu3 %v695_v50  ;;  %v814_v50 = vld [vmem:[%s1345_s17 + $0x60] sm:$0xff] }
 0x122   : > { %v609_v47 = vpop.f32.mrf.mxu2 }
 0x123   : > { %769 = vmatpush.msrb.mxu3 %v694_v52  ;;  %v507_v48 = vpop.f32.mrf.mxu0  ;;  %v708_v52 = vmax.f32 %v1284_v43, 0.0  ;;  %v809_v43 = vld [vmem:[%s1345_s17 + $0x38] sm:$0xff] }
 0x124   : > { %v669_v12 = vmax.f32 %v507_v48, 0.0  ;;  %v706_v48 = vmax.f32 %v1268_v32, 0.0  ;;  %v702_v32 = vmax.f32 %v606_v46, 0.0 }
 0x125   : > { %770 = vmatpush.msrb.mxu3 %v693_v17  ;;  %v707_v17 = vmax.f32 %v1276_v37, 0.0  ;;  %v704_v37 = vmax.f32 %v1253_v23, 0.0  ;;  %v807_v23 = vld [vmem:[%s1345_s17 + $0x28] sm:$0xff] }
 0x126   : > { %722 = vmatpush.msrb.mxu1 %v669_v12  ;;  %v810_v12 = vld [vmem:[%s1345_s17 + $0x40] sm:$0xff] }
 0x127   : > { %771 = vmatpush.msrb.mxu3 %v692_v54  ;;  %v705_v54 = vmax.f32 %v1262_v28, 0.0  ;;  %v721_v28 = vld [vmem:[%s1423_s1 + $0x18] sm:$0xff] }
 0x128   : > { %723 = vmatpush.msrb.mxu1 %v668_v44  ;;  %v703_v44 = vmax.f32 %v609_v47, 0.0 }
 0x129   : > { %772 = vmatpush.msrb.mxu3 %v691_v55  ;;  %v808_v55 = vld [vmem:[%s1345_s17 + $0x30] sm:$0xff] }
 0x12a   : > { %724 = vmatpush.msrb.mxu1 %v667_v40  ;;  %v806_v40 = vld [vmem:[%s1345_s17 + $0x20] sm:$0xff] }
 0x12b   : > { %773 = vmatpush.msrb.mxu3 %v690_v59  ;;  %v510_v29 = vpop.f32.mrf.mxu0  ;;  %v804_v59 = vld [vmem:[%s1345_s17 + $0x10] sm:$0xff] }
 0x12c   : > { %725 = vmatpush.msrb.mxu1 %v666_v36  ;;  %v670_v16 = vmax.f32 %v510_v29, 0.0  ;;  %v803_v36 = vld [vmem:[%s1345_s17 + $0x8] sm:$0xff]  ;;  %v856_v29 = vld [vmem:[%s1387_s30 + $0x70] sm:$0xff] }
 0x12d   : > { %774 = vmatpush.msrb.mxu3 %v689_v60  ;;  %v857_v60 = vld [vmem:[%s1387_s30 + $0x78] sm:$0xff] }
 0x12e   : > { %726 = vmatpush.msrb.mxu1 %v665_v62  ;;  %v854_v62 = vld [vmem:[%s1387_s30 + $0x60] sm:$0xff] }
 0x12f   : > { %775 = vmatpush.msrb.mxu3 %v688_v61  ;;  %v855_v61 = vld [vmem:[%s1387_s30 + $0x68] sm:$0xff] }
 0x130   : > { %727 = vmatpush.msrb.mxu1 %v664_v63  ;;  %v852_v63 = vld [vmem:[%s1387_s30 + $0x50] sm:$0xff] }
 0x131   : > { %776 = vmatpush.msrb.mxu3 %v687_v24  ;;  %v853_v24 = vld [vmem:[%s1387_s30 + $0x58] sm:$0xff] }
 0x132   : > { %728 = vmatpush.msrb.mxu1 %v663_v0  ;;  %v850_v0 = vld [vmem:[%s1387_s30 + $0x40] sm:$0xff] }
 0x133   : > { %v513_v1 = vpop.f32.mrf.mxu0  ;;  %777 = vmatpush.msrb.mxu3 %v686_v18  ;;  %v851_v18 = vld [vmem:[%s1387_s30 + $0x48] sm:$0xff] }
 0x134   : > { %729 = vmatpush.msrb.mxu1 %v662_v13  ;;  %778 = vmatmul.f32.vlgmr.msrb.gmra.mxu3 %v720_v49  ;;  %v671_v14 = vmax.f32 %v513_v1, 0.0  ;;  %v849_v13 = vld [vmem:[%s1387_s30 + $0x38] sm:$0xff]  ;;  %v848_v1 = vld [vmem:[%s1387_s30 + $0x30] sm:$0xff] }
 0x135   : > { %862 = vmatpush.msra.mxu3 %v857_v60  ;;  %v845_v49 = vld [vmem:[%s1387_s30 + $0x18] sm:$0xff] }
 0x136   : > { %730 = vmatpush.msrb.mxu1 %v661_v57  ;;  %v847_v57 = vld [vmem:[%s1387_s30 + $0x28] sm:$0xff] }
 0x137   : > { %863 = vmatpush.msra.mxu3 %v856_v29 }
 0x138   : > { %731 = vmatpush.msrb.mxu1 %v660_v4  ;;  %v846_v4 = vld [vmem:[%s1387_s30 + $0x20] sm:$0xff] }
 0x139   : > { %864 = vmatpush.msra.mxu3 %v855_v61 }
 0x13a   : > { %732 = vmatpush.msrb.mxu1 %v659_v53 }
 0x13b   : > { %v516_v5 = vpop.f32.mrf.mxu0  ;;  %865 = vmatpush.msra.mxu3 %v854_v62 }
 0x13c   : > { %733 = vmatpush.msrb.mxu1 %v658_v45  ;;  %v672_v25 = vmax.f32 %v516_v5, 0.0  ;;  %v844_v5 = vld [vmem:[%s1387_s30 + $0x10] sm:$0xff] }
 0x13d   : > { %866 = vmatpush.msra.mxu3 %v853_v24 }
 0x13e   : > { %734 = vmatpush.msrb.mxu1 %v657_v6 }
 0x13f   : > { %867 = vmatpush.msra.mxu3 %v852_v63 }
 0x140   : > { %735 = vmatpush.msrb.mxu1 %v656_v41 }
 0x141   : > { %868 = vmatpush.msra.mxu3 %v851_v18 }
 0x142   : > { %736 = vmatpush.msrb.mxu1 %v655_v7 }
 0x143   : > { %v519_v9 = vpop.f32.mrf.mxu0  ;;  %869 = vmatpush.msra.mxu3 %v850_v0 }
 0x144   : > { %737 = vmatpush.msrb.mxu1 %v654_v8  ;;  %v673_v11 = vmax.f32 %v519_v9, 0.0  ;;  %v842_v8 = vld [vmem:[%s1387_s30] sm:$0xff] }
 0x145   : > { %738 = vmatmul.f32.vlgmr.msrb.gmra.mxu1 %v718_v30  ;;  %870 = vmatpush.msra.mxu3 %v849_v13  ;;  %v1081_v9 = vld [vmem:[%s352_s27] ss:$0 sm:$0xff] }
 0x146   : > { %782 = vmatpush.msra.mxu1 %v717_v34  ;;  %754 = vmatpush.msrb.mxu2 %v673_v11  ;;  %v843_v34 = vld [vmem:[%s1387_s30 + $0x8] sm:$0xff]  ;;  %v1082_v11 = vld [vmem:[%s360_s9] ss:$0 sm:$0xff] }
 0x147   : > { %871 = vmatpush.msra.mxu3 %v848_v1 }
 0x148   : > { %783 = vmatpush.msra.mxu1 %v716_v15  ;;  %755 = vmatpush.msrb.mxu2 %v672_v25 }
 0x149   : > { %872 = vmatpush.msra.mxu3 %v847_v57 }
 0x14a   : > { %784 = vmatpush.msra.mxu1 %v715_v19  ;;  %756 = vmatpush.msrb.mxu2 %v671_v14 }
 0x14b   : > { %873 = vmatpush.msra.mxu3 %v846_v4 }
 0x14c   : > { %785 = vmatpush.msra.mxu1 %v714_v10  ;;  %757 = vmatpush.msrb.mxu2 %v670_v16 }
 0x14d   : > { %758 = vmatmul.f32.vlgmr.msrb.gmra.mxu2 %v719_v21  ;;  %874 = vmatpush.msra.mxu3 %v845_v49 }
 0x14e   : > { %786 = vmatpush.msra.mxu1 %v713_v26  ;;  %822 = vmatpush.msra.mxu2 %v817_v31 }
 0x14f   : > { %875 = vmatpush.msra.mxu3 %v844_v5 }
 0x150   : > { %787 = vmatpush.msra.mxu1 %v712_v35  ;;  %823 = vmatpush.msra.mxu2 %v816_v39 }
 0x151   : > { %876 = vmatpush.msra.mxu3 %v843_v34 }
 0x152   : > { %788 = vmatpush.msra.mxu1 %v711_v27  ;;  %824 = vmatpush.msra.mxu2 %v815_v42 }
 0x153   : > { %877 = vmatpush.msra.mxu3 %v842_v8 }
 0x154   : > { %789 = vmatpush.msra.mxu1 %v710_v20  ;;  %825 = vmatpush.msra.mxu2 %v814_v50 }
 0x156   : > { %790 = vmatpush.msra.mxu1 %v709_v2  ;;  %826 = vmatpush.msra.mxu2 %v813_v22 }
 0x158   : > { %791 = vmatpush.msra.mxu1 %v708_v52  ;;  %827 = vmatpush.msra.mxu2 %v812_v56 }
 0x15a   : > { %792 = vmatpush.msra.mxu1 %v707_v17  ;;  %828 = vmatpush.msra.mxu2 %v811_v51 }
 0x15c   : > { %793 = vmatpush.msra.mxu1 %v706_v48  ;;  %829 = vmatpush.msra.mxu2 %v810_v12 }
 0x15e   : > { %794 = vmatpush.msra.mxu1 %v705_v54  ;;  %830 = vmatpush.msra.mxu2 %v809_v43 }
 0x160   : > { %795 = vmatpush.msra.mxu1 %v704_v37  ;;  %831 = vmatpush.msra.mxu2 %v808_v55 }
 0x162   : > { %796 = vmatpush.msra.mxu1 %v703_v44  ;;  %832 = vmatpush.msra.mxu2 %v807_v23 }
 0x164   : > { %797 = vmatpush.msra.mxu1 %v702_v32  ;;  %833 = vmatpush.msra.mxu2 %v806_v40 }
 0x165   : > { %798 = vmatmul.f32.vlgmr.msra.gmra.mxu1 %v721_v28 }
 0x166   : > { %834 = vmatpush.msra.mxu2 %v805_v58 }
 0x168   : > { %835 = vmatpush.msra.mxu2 %v804_v59 }
 0x16a   : > { %836 = vmatpush.msra.mxu2 %v803_v36 }
 0x16c   : > { %837 = vmatpush.msra.mxu2 %v802_v33 }
 0x1b7   : > { %v779_v6 = vpop.f32.mrf.mxu3 }
 0x1c2   : > { %v739_v3 = vpop.f32.mrf.mxu1 }
 0x1d0   : > { %v759_v53 = vpop.f32.mrf.mxu2 }
 0x1d1   : > { %v760_v45 = vadd.f32 %v759_v53, %v739_v3 }
 0x1d3   : > { %v780_v41 = vadd.f32 %v779_v6, %v760_v45 }
 0x1e2   : > { %v799_v38 = vpop.f32.mrf.mxu1 }
 0x1e3   : > { %v800_v7 = vadd.f32 %v799_v38, %v780_v41 }
 0x1e5   : > { %838 = vmatmul.f32.vlgmr.msra.gmra.mxu2 %v800_v7 }
 0x268   : > { %v839_v30 = vpop.f32.mrf.mxu2 }
 0x269   : > { %v840_v25 = vadd.f32 %v1081_v9, %v839_v30 }
 0x26b   : > { %878 = vmatmul.f32.vlgmr.msra.gmra.mxu3 %v840_v25 }
 0x2ee   : > { %v879_v15 = vpop.f32.mrf.mxu3 }
 0x2ef   : > { %v880_v19 = vadd.f32 %v1082_v11, %v879_v15 }
 0x2f1   : > { %v882_v14 = vmul.f32 %v880_v19, %v880_v19 }
 0x2f3   : > { %883 = vadd.xlane.f32.xlu0 %v882_v14 }
 0x366   : > { %v884_v10 = vpop.xlane.xlu0 %883 }
 0x367   : > { %v885_v16 = vmax.f32 %v884_v10, 1e-24 }
 0x369   : > { %1083 = vrsqrt.f32 %v885_v16  ;;  %vm892_vm1 = vweird.f32 %v885_v16 }
 0x36f   : > { %v1084_v21 = vpop.eup %1083 }
 0x370   : > { %v887_v26 = vmul.f32 %v1084_v21, %v885_v16  ;;  %vm893_vm0 = vweird.f32 %v1084_v21 }
 0x371   : > { %vm894_vm2 = vmor %vm892_vm1, %vm893_vm0 }
 0x372   : > { %v888_v31 = vmul.f32 %v1084_v21, %v887_v26 }
 0x374   : > { %v889_v35 = vmul.f32 0.5, %v888_v31 }
 0x376   : > { %v890_v39 = vsub.f32 1.5, %v889_v35 }
 0x378   : > { %v891_v27 = vmul.f32 %v1084_v21, %v890_v39 }
 0x37a   : > { %v895_v42 = vsel %vm894_vm2, %v1084_v21, %v891_v27 }
 0x37b   : > { %v896_v46 = vmul.f32 %v895_v42, %v880_v19 }
 0x37d   : > { %897 = vst [vmem:[%s364_s15] sm:$0xff] %v896_v46 }
 0x37e PF: > { %s17_s24 = sadd.s32 1, %s1091_s24  }
 0x37f   : > { %p14_p4 = scmp.ge.s32.totalorder %s17_s24, 4  }
 0x381   :  { %16 = sbr.rel (!%p14_p4) target bundleno = 1 (0x1), region = 93 }

// kernel: moco_forward.5
= control target key start
LH: loop header
LB: loop body
LE: loop exit
PB: predicated region body
PF: predicated region fallthrough
CT: control target
= control target key end

     0   :  { %12 = vsyncpa [#allocation6], 0  ;;  %s357_s0 = inlined_call_operand.<no memory space> [shape: s32[1], index: 0, kind: input, shape index: {}]   ;;  %s358_s1 = inlined_call_operand.vmem [shape: f32[8,128], index: 1, kind: input, shape index: {}]   ;;  %s359_s2 = inlined_call_operand.vmem [shape: f32[8,128], index: 2, kind: input, shape index: {}]   ;;  %s360_s3 = inlined_call_operand.vmem [shape: f32[64,128], index: 3, kind: input, shape index: {}, may-alias: {3,5}]   ;;  %s361_s4 = inlined_call_operand.hbm [shape: f32[1,1], index: 4, kind: output, shape index: {0}]   ;;  %s362_s5 = inlined_call_operand.vmem [shape: f32[64,128], index: 5, kind: output, shape index: {1}, may-alias: {3,5}]  }
   0x1   :  { %v29_v0 = vld [vmem:[%s360_s3] sm:$0xff]  ;;  %v31_v1 = vld [vmem:[%s360_s3 + $0x8] sm:$0xff]  ;;  %v33_v2 = vld [vmem:[%s360_s3 + $0x10] sm:$0xff] }
   0x2   :  { %v35_v3 = vld [vmem:[%s360_s3 + $0x18] sm:$0xff]  ;;  %v37_v4 = vld [vmem:[%s360_s3 + $0x20] sm:$0xff]  ;;  %v39_v5 = vld [vmem:[%s360_s3 + $0x28] sm:$0xff] }
   0x3   :  { %v41_v6 = vld [vmem:[%s360_s3 + $0x30] sm:$0xff]  ;;  %v43_v7 = vld [vmem:[%s360_s3 + $0x38] sm:$0xff] }
   0x4   :  { %50 = vsyncadd [#allocation3], 1024  ;;  %76 = vmatpush.xpose.msra.mxu0 %v43_v7 }
   0x5   :  { %269 = dma.done.wait [#allocation3], 1024 }
   0x6   :  { %270 = vsyncadd [#allocation3], 4294966272  ;;  %s338_s13 = scalar_lea.vmem %s362_s5, %s357_s0  ;;  %v244_v8 = vld [vmem:[%s359_s2 + $0x4] sm:$0xf]  ;;  %vm89_vm0 = vcmask 523264   ;;  %vm108_vm1 = vcmask 7168  }
   0x7   :  { %v54_v9 = vld [vmem:[%s358_s1] sm:$0xff]  ;;  %141 = vst [vmem:[%s338_s13] sm:$0xf] %v244_v8 }
   0x8   :  { %77 = vmatpush.xpose.msra.mxu0 %v41_v6  ;;  %v55_v10 = vld [vmem:[%s359_s2] sm:$0xff] }
   0x9   :  { %v56_v11 = vmul.f32 %v55_v10, %v54_v9 }
   0xb   :  { %57 = vadd.xlane.f32.xlu0 %v56_v11 }
   0xc   :  { %78 = vmatpush.xpose.msra.mxu0 %v39_v5 }
  0x10   :  { %79 = vmatpush.xpose.msra.mxu0 %v37_v4 }
  0x14   :  { %80 = vmatpush.xpose.msra.mxu0 %v35_v3 }
  0x18   :  { %81 = vmatpush.xpose.msra.mxu0 %v33_v2 }
  0x1c   :  { %82 = vmatpush.xpose.msra.mxu0 %v31_v1 }
  0x20   :  { %83 = vmatpush.xpose.msra.mxu0 %v29_v0 }
  0x23   :  { %84 = vmatmul.f32.vlgmr.msra.gmra.mxu0 %v54_v9 }
  0x7e   :  { %v58_v15 = vpop.xlane.xlu0 %57 }
  0x7f   :  { %v59_v16 = vmul.f32 14.285714, %v58_v15 }
  0xa0   :  { %v85_v12 = vpop.f32.mrf.mxu0 }
  0xa1   :  { %v88_v13 = vmul.f32 14.285714, %v85_v12 }
  0xa3   :  { %v90_v14 = vsel %vm89_vm0, %v88_v13, -inf }
  0xa4   :  { %91 = vmax.xlane.f32.xlu0 %v90_v14 }
 0x117   :  { %v92_v17 = vpop.xlane.xlu0 %91 }
 0x118   :  { %v93_v18 = vmax.f32 %v92_v17, %v59_v16 }
 0x11a   :  { %v97_v19 = vsub.f32 %v88_v13, %v93_v18  ;;  %v94_v23 = vsub.f32 %v59_v16, %v93_v18 }
 0x11c   :  { %v98_v20 = vmul.f32 1.442695, %v97_v19  ;;  %v95_v24 = vmul.f32 1.442695, %v94_v23 }
 0x11e   :  { %251 = vpow2.f32 %v98_v20 }
 0x11f   :  { %253 = vpow2.f32 %v95_v24 }
 0x124   :  { %v252_v21 = vpop.eup %251 }
 0x125   :  { %v100_v22 = vsel %vm89_vm0, %v252_v21, 0.0  ;;  %v254_v25 = vpop.eup %253 }
 0x126   :  { %101 = vadd.xlane.f32.xlu1 %v100_v22 }
 0x199   :  { %v102_v26 = vpop.xlane.xlu1 %101 }
 0x19a   :  { %v103_v27 = vadd.f32 %v254_v25, %v102_v26 }
 0x19c   :  { %255 = vlog2.f32 %v103_v27 }
 0x1a2   :  { %v256_v28 = vpop.eup %255 }
 0x1a3   :  { %v105_v29 = vmul.f32 0.6931472, %v256_v28 }
 0x1a5   :  { %v106_v30 = vadd.f32 %v105_v29, %v93_v18 }
 0x1a7   :  { %v107_v31 = vsub.f32 %v106_v30, %v59_v16 }
 0x1a9   :  { %v109_v32 = vsel %vm108_vm1, %v107_v31, 0.0 }
 0x1aa   :  { %110 = vadd.xlane.f32.xlu1 %v109_v32 }
 0x21d   :  { %v111_v33 = vpop.xlane.xlu1 %110 }
 0x21e   :  { %v112_v34 = vrot.slane %v111_v33, 4 }
 0x220   :  { %v113_v35 = vadd.f32 %v112_v34, %v111_v33 }
 0x222   :  { %v114_v36 = vrot.slane %v113_v35, 2 }
 0x224   :  { %v115_v37 = vadd.f32 %v114_v36, %v113_v35 }
 0x226   :  { %v116_v38 = vrot.slane %v115_v37, 1 }
 0x228   :  { %v117_v39 = vadd.f32 %v116_v38, %v115_v37 }
 0x22a   :  { %248 = vpush %v117_v39 }
 0x25b   :  { %s249_s0 = spop %248 }
 0x25c   :  { %s119_s1 = smul.f32 0.25, %s249_s0 }
 0x25e   :  { %121 = sst [smem:[#allocation5]] %s119_s1 }
 0x25f   :  { %159 = vsyncadd [#allocation3], 64  ;;  %v176_v40 = vld [vmem:[%s359_s2] sm:$0xf] }
 0x260   :  { %245 = vst [vmem:[%s338_s13 + $0x4] sm:$0xf] %v176_v40 }
 0x261   :  { %195 = vsyncadd [#allocation3 + $0x1], 64 }
 0x262   :  { %271 = dma.done.wait [#allocation3], 64 }
 0x263   :  { %272 = vsyncadd [#allocation3], 4294967232 }
 0x264   :  { %273 = dma.done.wait [#allocation3 + $0x1], 64 }
 0x265   :  { %274 = vsyncadd [#allocation3 + $0x1], 4294967232  ;;  %s206_s22 = sshll.u32 %s361_s4, 4  ;;  %s277_s23 = smov [#allocation5]   ;;  %s207_s22 = int_to_ptr.hbm [resolvable:$true] %s206_s22 }
 0x266   :  { %209 = dma.smem_to_hbm %s277_s23, 16, %s207_s22, [#allocation6]  }
 0x267   :  { %275 = dma.done.wait [#allocation6], 16  }
 0x268   :  { %276 = vsyncadd [#allocation6], 4294967280 }
 0x269   :  { %214 = sfence }
 0x26a   :  { %215 = vsyncpa [#allocation6], 1 }
 0x26b   :  { %216 = vsyncmov [#allocation3] }
 0x26e   :  { %s217_s24 = vpop.sfrf %216 }
 0x26f   :  { %p246_p0 = scmp.ne.s32.totalorder %s217_s24, 0 }
 0x271   :  { %221 = shalt.err (%p246_p0)  }
 0x272   :  { %223 = vsyncmov [#allocation3 + $0x1] }
 0x275   :  { %s224_s2 = vpop.sfrf %223 }
 0x276   :  { %p247_p1 = scmp.ne.s32.totalorder %s224_s2, 0 }
 0x278   :  { %228 = shalt.err (%p247_p1)  }

</bundles_post_ra>
